<compile_context>
chip_gen: v7x
topology: tpu7x:2x2x1
jax: 0.10.0
libtpu: 0.0.40
codegen_flags: <defaults>
</compile_context>

<pallas_src>
import jax
import jax.numpy as jnp
from jax import lax
from jax.experimental import pallas as pl
from jax.experimental.pallas import tpu as pltpu

# ------------------------- configuration (small shapes) ----------------------
BATCH = 2
NUM_SIGNALS = 4
MAX_SEQ_LEN = 16
NUM_CHANNELS = 2            # [timeChannel, signalChannel]  (modelConstants.signalChannelNames)
ENCODED_DIM = 128           # userInputParams['encodedDimension']
NUM_EXPERIMENTS = 4
NUM_SPECIFIC_LAYERS = 1     # numSpecificEncoderLayers
NUM_SHARED_LAYERS = 2       # numSharedEncoderLayers
NUM_BASIC_EMOTIONS = 6
NUM_EMOTIONS = 3


# ------------------------------ fused Pallas kernel ----------------------------
def _fused_signal_encoder_kernel(x0_ref, layer_w_ref, time_ref,
                                 resampled_ref, recon_full_ref):
    """On-chip: residual tanh encoder stack + hat-function interpolation (all MXU-shaped)."""
    R, D = resampled_ref.shape
    RT = recon_full_ref.shape[-1]            # R * maxSequenceLength (lane-dense)
    L = layer_w_ref.shape[0]

    # --- signalEncoderPass: specific -> shared -> specific residual tanh(x @ W_l) layers -
    x = x0_ref[...]                                           # (R, D) f32 smoothed profile
    for l in range(L):                                        # static unroll, L small
        h = jnp.dot(x.astype(jnp.bfloat16), layer_w_ref[l],
                    preferred_element_type=jnp.float32)       # bf16 MXU, f32 accumulate
        x = x + jnp.tanh(h)                                   # residual + tanh kept in f32
    resampled_ref[...] = x

    # --- sharedSignalEncoderModel.interpolateData ----------------------------------------
    # Hat weights with d on the sublane axis, (row, time) flattened on the lane axis:
    #   w[d, r*T + t] = max(0, 1 - |time[r,t]*(D-1) - d|)
    # so recon[r, t] = (x @ w)[r, r*T + t]  — a single (R, D)@(D, R*T) bf16 MXU matmul.
    pos = time_ref[...] * jnp.float32(D - 1)                  # (1, RT), times in [0, 1]
    # int32 iota + one convert (Mosaic float-iota support varies); negligible VPU cost.
    d_idx = lax.broadcasted_iota(jnp.int32, (D, RT), 0).astype(jnp.float32)
    w = jnp.maximum(0.0, 1.0 - jnp.abs(pos - d_idx))          # (D, RT) f32 hat weights
    recon_full_ref[...] = jnp.dot(x.astype(jnp.bfloat16), w.astype(jnp.bfloat16),
                                  preferred_element_type=jnp.float32)   # (R, RT) lane-dense


def fused_signal_encoder(x0, layer_w, time_flat):
    """One grid-less pallas_call; whole working set (<0.2 MiB) stays resident in VMEM."""
    R, D = x0.shape
    RT = time_flat.shape[-1]
    return pl.pallas_call(
        _fused_signal_encoder_kernel,
        out_shape=(
            jax.ShapeDtypeStruct((R, D), jnp.float32),        # resampledSignalData (flat)
            jax.ShapeDtypeStruct((R, RT), jnp.float32),       # interpolation slab (lane-dense)
        ),
        in_specs=[
            pl.BlockSpec(memory_space=pltpu.VMEM),            # smoothed+repeated profile slab
            pl.BlockSpec(memory_space=pltpu.VMEM),            # encoder layer weights (bf16)
            pl.BlockSpec(memory_space=pltpu.VMEM),            # flattened timepoints (1, R*T)
        ],
        out_specs=(
            pl.BlockSpec(memory_space=pltpu.VMEM),
            pl.BlockSpec(memory_space=pltpu.VMEM),
        ),
    )(x0, layer_w, time_flat)


# ------------------------------ parameter init ---------------------------------
def init_params(key):
    k_profile, k_layers = jax.random.split(key, 2)
    # specificSignalEncoderModel.profileModel physiological-profile table (f32)
    profile_table = 0.1 * jax.random.normal(
        k_profile, (NUM_EXPERIMENTS, ENCODED_DIM), jnp.float32)
    # Gaussian band matrix used by smoothPhysiologicalProfile (deterministic),
    # folded into the table offline: smoothed_table = profile_table @ smooth.
    idx = jnp.arange(ENCODED_DIM, dtype=jnp.float32)
    diff = idx[:, None] - idx[None, :]
    sigma = 2.0
    smooth = jnp.exp(-0.5 * (diff / sigma) ** 2)
    smooth = smooth / jnp.sum(smooth, axis=0, keepdims=True)
    smoothed_table = (profile_table @ smooth).astype(jnp.float32)
    # specific(0..nSpec-1) -> shared(0..nShared-1) -> specific(nSpec..2nSpec-1) layers, bf16
    n_layers = 2 * NUM_SPECIFIC_LAYERS + NUM_SHARED_LAYERS
    layer_w = (0.02 * jax.random.normal(
        k_layers, (n_layers, ENCODED_DIM, ENCODED_DIM), jnp.float32)).astype(jnp.bfloat16)
    return smoothed_table, layer_w


# ------------------------------ forward pass -----------------------------------
def emotion_model_head_forward(signal_data, signal_identifiers, metadata, params):
    """submodel == signalEncoderModel, onlyProfileTraining=False."""
    smoothed_table, layer_w = params

    signal_identifiers = signal_identifiers.astype(jnp.int32)
    metadata = metadata.astype(jnp.int32)
    signal_data = signal_data.astype(jnp.float32)

    B, S, T, C = signal_data.shape
    D = smoothed_table.shape[-1]
    R = B * S
    assert C == NUM_CHANNELS

    # emotion/activity branches are only active when submodel == emotionModel
    basic_emotion_profile = jnp.zeros((B, NUM_BASIC_EMOTIONS, D), jnp.float32)
    emotion_profile = jnp.zeros((B, NUM_EMOTIONS, D), jnp.float32)
    activity_profile = jnp.zeros((B, D), jnp.float32)

    # emotionDataInterface.getSignalIdentifierData(..., batchIndexSI)[:, 0]
    batch_inds = signal_identifiers[:, 0, 0]                       # (B,)
    # emotionDataInterface.getValidDataMask(signalData)
    valid_data_mask = jnp.any(signal_data != 0, axis=-1)           # (B, S, T) bool

    # profileModel.getPhysiologicalProfile + smoothPhysiologicalProfile (smoothing folded
    # into the table offline, so the gather IS the smoothed profile).
    physiological_profile = smoothed_table[batch_inds]             # (B, D)
    # resampledSignalData = profile.unsqueeze(1).repeat(1, numSignals, 1) -> flat (R, D)
    x0 = jnp.repeat(physiological_profile, S, axis=0)              # (R, D)

    # time channel, flattened so (row, time) sits on the lane axis of the kernel output
    time_flat = signal_data[..., 0].reshape(1, R * T)              # (1, R*T)

    # fused: signalEncoderPass + interpolateData (one VMEM-resident pallas_call)
    resampled_flat, recon_full = fused_signal_encoder(x0, layer_w, time_flat)
    compiled_signal_encoder_layer_state = None                     # compileLayerStates=False

    # per-row block diagonal of the lane-dense interpolation slab: recon[r,t] = Y[r, r*T+t]
    row_ids = jnp.arange(R)
    recon_flat = recon_full.reshape(R, R, T)[row_ids, row_ids, :]  # (R, T)

    resampled = resampled_flat.reshape(B, S, D)
    reconstructed = recon_flat.reshape(B, S, T)

    return (valid_data_mask, reconstructed, resampled,
            compiled_signal_encoder_layer_state, physiological_profile,
            activity_profile, basic_emotion_profile, emotion_profile)


forward_jit = jax.jit(emotion_model_head_forward)


# ------------------------------ driver ------------------------------------------
if __name__ == "__main__":
    key = jax.random.PRNGKey(0)
    k_params, k_sig, k_len = jax.random.split(key, 3)
    params = init_params(k_params)

    # signalData: (B, numSignals, maxSequenceLength, numChannels) = [time, value]
    times = jnp.broadcast_to(
        jnp.linspace(0.05, 0.95, MAX_SEQ_LEN, dtype=jnp.float32),
        (BATCH, NUM_SIGNALS, MAX_SEQ_LEN))
    values = 0.5 * jax.random.normal(k_sig, (BATCH, NUM_SIGNALS, MAX_SEQ_LEN), jnp.float32)
    signal_data = jnp.stack([times, values], axis=-1)
    # simulate padded (invalid) trailing points on half the signals
    pad_mask = (jnp.arange(MAX_SEQ_LEN) < MAX_SEQ_LEN - 3)[None, None, :, None]
    keep_signal = (jnp.arange(NUM_SIGNALS) < NUM_SIGNALS // 2)[None, :, None, None]
    signal_data = signal_data * jnp.where(keep_signal, 1.0, pad_mask.astype(jnp.float32))

    # signalIdentifiers: (B, numSignals, numIdChannels); channel 0 = batch/experiment index
    batch_index = jnp.arange(BATCH, dtype=jnp.int32) % NUM_EXPERIMENTS
    signal_identifiers = jnp.stack([
        jnp.broadcast_to(batch_index[:, None], (BATCH, NUM_SIGNALS)),
        jnp.broadcast_to(jnp.arange(NUM_SIGNALS, dtype=jnp.int32)[None, :], (BATCH, NUM_SIGNALS)),
        jnp.zeros((BATCH, NUM_SIGNALS), jnp.int32),
    ], axis=-1)

    # metadata: (B, numMetadataChannels) int
    metadata = jnp.stack([jnp.arange(BATCH, dtype=jnp.int32),
                          jnp.zeros((BATCH,), jnp.int32)], axis=-1)

    outputs = forward_jit(signal_data, signal_identifiers, metadata, params)
    outputs = jax.block_until_ready(outputs)

    (valid_mask, recon, resampled, layer_state, phys_profile,
     act_profile, basic_emo, emo_profile) = outputs
    assert valid_mask.shape == (BATCH, NUM_SIGNALS, MAX_SEQ_LEN)
    assert recon.shape == (BATCH, NUM_SIGNALS, MAX_SEQ_LEN)
    assert resampled.shape == (BATCH, NUM_SIGNALS, ENCODED_DIM)
    assert phys_profile.shape == (BATCH, ENCODED_DIM)
    assert act_profile.shape == (BATCH, ENCODED_DIM)
    assert basic_emo.shape == (BATCH, NUM_BASIC_EMOTIONS, ENCODED_DIM)
    assert emo_profile.shape == (BATCH, NUM_EMOTIONS, ENCODED_DIM)
    assert layer_state is None
    assert bool(jnp.all(jnp.isfinite(recon))) and bool(jnp.all(jnp.isfinite(resampled)))
    print("KERNEL_OK")
</pallas_src>

<mosaic_0001>
module attributes {stable_mosaic.version = 11 : i64} {
  func.func @_fused_signal_encoder_kernel(%arg0: memref<8x128xf32, #tpu.memory_space<vmem>>, %arg1: memref<4x128x128xbf16, #tpu.memory_space<vmem>>, %arg2: memref<1x128xf32, #tpu.memory_space<vmem>>, %arg3: memref<8x128xf32, #tpu.memory_space<vmem>>, %arg4: memref<8x128xf32, #tpu.memory_space<vmem>>) attributes {dimension_semantics = [], scalar_prefetch = 0 : i64, scratch_operands = 0 : i64, tpu.core_type = #tpu.core_type<tc>} {
    %c0 = arith.constant 0 : index
    %c0_0 = arith.constant 0 : index
    %0 = vector.load %arg0[%c0, %c0_0] : memref<8x128xf32, #tpu.memory_space<vmem>>, vector<8x128xf32>
    %1 = arith.truncf %0 : vector<8x128xf32> to vector<8x128xbf16>
    %c0_1 = arith.constant 0 : index
    %c0_2 = arith.constant 0 : index
    %c0_3 = arith.constant 0 : index
    %2 = vector.load %arg1[%c0_1, %c0_2, %c0_3] : memref<4x128x128xbf16, #tpu.memory_space<vmem>>, vector<1x128x128xbf16>
    %3 = vector.shape_cast %2 : vector<1x128x128xbf16> to vector<128x128xbf16>
    %cst = arith.constant dense<0.000000e+00> : vector<8x128xf32>
    %4 = tpu.matmul %1, %3, %cst {dimension_numbers = #tpu.dot_dimension_numbers<[1], [0], [0], [1], [0, 0, 1, 1], [], []>} : vector<8x128xbf16>, vector<128x128xbf16>, vector<8x128xf32> -> vector<8x128xf32>
    %5 = math.tanh %4 : vector<8x128xf32>
    %6 = arith.addf %0, %5 : vector<8x128xf32>
    %7 = arith.truncf %6 : vector<8x128xf32> to vector<8x128xbf16>
    %c1 = arith.constant 1 : index
    %c0_4 = arith.constant 0 : index
    %c0_5 = arith.constant 0 : index
    %8 = vector.load %arg1[%c1, %c0_4, %c0_5] : memref<4x128x128xbf16, #tpu.memory_space<vmem>>, vector<1x128x128xbf16>
    %9 = vector.shape_cast %8 : vector<1x128x128xbf16> to vector<128x128xbf16>
    %cst_6 = arith.constant dense<0.000000e+00> : vector<8x128xf32>
    %10 = tpu.matmul %7, %9, %cst_6 {dimension_numbers = #tpu.dot_dimension_numbers<[1], [0], [0], [1], [0, 0, 1, 1], [], []>} : vector<8x128xbf16>, vector<128x128xbf16>, vector<8x128xf32> -> vector<8x128xf32>
    %11 = math.tanh %10 : vector<8x128xf32>
    %12 = arith.addf %6, %11 : vector<8x128xf32>
    %13 = arith.truncf %12 : vector<8x128xf32> to vector<8x128xbf16>
    %c2 = arith.constant 2 : index
    %c0_7 = arith.constant 0 : index
    %c0_8 = arith.constant 0 : index
    %14 = vector.load %arg1[%c2, %c0_7, %c0_8] : memref<4x128x128xbf16, #tpu.memory_space<vmem>>, vector<1x128x128xbf16>
    %15 = vector.shape_cast %14 : vector<1x128x128xbf16> to vector<128x128xbf16>
    %cst_9 = arith.constant dense<0.000000e+00> : vector<8x128xf32>
    %16 = tpu.matmul %13, %15, %cst_9 {dimension_numbers = #tpu.dot_dimension_numbers<[1], [0], [0], [1], [0, 0, 1, 1], [], []>} : vector<8x128xbf16>, vector<128x128xbf16>, vector<8x128xf32> -> vector<8x128xf32>
    %17 = math.tanh %16 : vector<8x128xf32>
    %18 = arith.addf %12, %17 : vector<8x128xf32>
    %19 = arith.truncf %18 : vector<8x128xf32> to vector<8x128xbf16>
    %c3 = arith.constant 3 : index
    %c0_10 = arith.constant 0 : index
    %c0_11 = arith.constant 0 : index
    %20 = vector.load %arg1[%c3, %c0_10, %c0_11] : memref<4x128x128xbf16, #tpu.memory_space<vmem>>, vector<1x128x128xbf16>
    %21 = vector.shape_cast %20 : vector<1x128x128xbf16> to vector<128x128xbf16>
    %cst_12 = arith.constant dense<0.000000e+00> : vector<8x128xf32>
    %22 = tpu.matmul %19, %21, %cst_12 {dimension_numbers = #tpu.dot_dimension_numbers<[1], [0], [0], [1], [0, 0, 1, 1], [], []>} : vector<8x128xbf16>, vector<128x128xbf16>, vector<8x128xf32> -> vector<8x128xf32>
    %23 = math.tanh %22 : vector<8x128xf32>
    %24 = arith.addf %18, %23 : vector<8x128xf32>
    %c0_13 = arith.constant 0 : index
    %c0_14 = arith.constant 0 : index
    %25 = vector.load %arg3[%c0_13, %c0_14] : memref<8x128xf32, #tpu.memory_space<vmem>>, vector<8x128xf32>
    tpu.vector_store %arg3[%c0_13, %c0_14], %24 {strides = array<i32>} : memref<8x128xf32, #tpu.memory_space<vmem>>, vector<8x128xf32>,
    %c0_15 = arith.constant 0 : index
    %c0_16 = arith.constant 0 : index
    %26 = vector.load %arg2[%c0_15, %c0_16] : memref<1x128xf32, #tpu.memory_space<vmem>>, vector<1x128xf32>
    %cst_17 = arith.constant 1.270000e+02 : f32
    %27 = vector.broadcast %cst_17 : f32 to vector<1x128xf32>
    %28 = arith.mulf %26, %27 : vector<1x128xf32>
    %29 = tpu.iota {dimensions = array<i32: 0>} : vector<128x128xi32>
    %30 = arith.sitofp %29 : vector<128x128xi32> to vector<128x128xf32>
    %31 = vector.broadcast %28 : vector<1x128xf32> to vector<128x128xf32>
    %32 = arith.subf %31, %30 : vector<128x128xf32>
    %33 = math.absf %32 : vector<128x128xf32>
    %cst_18 = arith.constant 1.000000e+00 : f32
    %34 = vector.broadcast %cst_18 : f32 to vector<128x128xf32>
    %35 = arith.subf %34, %33 : vector<128x128xf32>
    %cst_19 = arith.constant 0.000000e+00 : f32
    %36 = vector.broadcast %cst_19 : f32 to vector<128x128xf32>
    %37 = arith.maximumf %36, %35 : vector<128x128xf32>
    %38 = arith.truncf %24 : vector<8x128xf32> to vector<8x128xbf16>
    %39 = arith.truncf %37 : vector<128x128xf32> to vector<128x128xbf16>
    %cst_20 = arith.constant dense<0.000000e+00> : vector<8x128xf32>
    %40 = tpu.matmul %38, %39, %cst_20 {dimension_numbers = #tpu.dot_dimension_numbers<[1], [0], [0], [1], [0, 0, 1, 1], [], []>} : vector<8x128xbf16>, vector<128x128xbf16>, vector<8x128xf32> -> vector<8x128xf32>
    %c0_21 = arith.constant 0 : index
    %c0_22 = arith.constant 0 : index
    %41 = vector.load %arg4[%c0_21, %c0_22] : memref<8x128xf32, #tpu.memory_space<vmem>>, vector<8x128xf32>
    tpu.vector_store %arg4[%c0_21, %c0_22], %40 {strides = array<i32>} : memref<8x128xf32, #tpu.memory_space<vmem>>, vector<8x128xf32>,
    return
  }
}

</mosaic_0001>

<bundles_post_ra>
// kernel: squeeze.3
= control target key start
LH: loop header
LB: loop body
LE: loop exit
PB: predicated region body
PF: predicated region fallthrough
CT: control target
= control target key end

     0   :  { %vm11_vm0 = vcmask 130048   ;;  %s70_s10 = smov 80   ;;  %s71_s11 = smov 96   ;;  %vm17_vm1 = vcmask 1048448   ;;  %vm23_vm2 = vcmask 917248   ;;  %vm29_vm3 = vcmask 786048   ;;  %s95_s0 = inlined_call_operand.vmem [shape: f32[2,4,16], index: 0, kind: input, shape index: {}]   ;;  %s96_s1 = inlined_call_operand.vmem [shape: f32[1,128], index: 1, kind: output, shape index: {}]  }
   0x1   :  { %v61_v0 = vld [vmem:[%s95_s0 + $0x4] sm:$0xf]  ;;  %v8_v1 = vld [vmem:[%s95_s0] sm:$0xf]  ;;  %s69_s0 = smov 112   ;;  %s72_s12 = smov 64  }
   0x2   :  { %7 = vst [vmem:[#allocation1 + $0x8] sm:$0xf] %v61_v0  ;;  %9 = vst [vmem:[#allocation1] sm:$0xf] %v8_v1  ;;  %s73_s13 = smov 48   ;;  %s74_s14 = smov 32  }
   0x3   :  { %s75_s15 = smov 16   ;;  %vm35_vm4 = vcmask 654848   ;;  %vm41_vm5 = vcmask 523648   ;;  %vm47_vm6 = vcmask 392448   ;;  %vm53_vm7 = vcmask 261248  }
   0x9   :  { %v14_v2 = vld [vmem:[#allocation1 + $0xb] sm:$0x1]   ;;  %v26_v3 = vld [vmem:[#allocation1 + $0x9] sm:$0x1]   ;;  %v20_v4 = vld [vmem:[#allocation1 + $0xa] sm:$0x1]  }
   0xa   :  { %15 = vrot.lane.b32.xlu0 %v14_v2, %s69_s0  ;;  %27 = vrot.lane.b32.xlu1 %v26_v3, %s70_s10  ;;  %v32_v5 = vld [vmem:[#allocation1 + $0x8] sm:$0x1]   ;;  %v10_v6 = vld [vmem:[#allocation1] sm:$0x1]   ;;  %v38_v7 = vld [vmem:[#allocation1 + $0x3] sm:$0x1]  }
   0xb   :  { %12 = vst.msk [vmem:[#allocation0] sm:$0x1] %vm11_vm0, %v10_v6   ;;  %v44_v8 = vld [vmem:[#allocation1 + $0x2] sm:$0x1]   ;;  %v50_v9 = vld [vmem:[#allocation1 + $0x1] sm:$0x1]  }
   0xe   :  { %21 = vrot.lane.b32.xlu0 %v20_v4, %s71_s11  ;;  %33 = vrot.lane.b32.xlu1 %v32_v5, %s72_s12 }
  0x12   :  { %39 = vrot.lane.b32.xlu0 %v38_v7, %s73_s13  ;;  %45 = vrot.lane.b32.xlu1 %v44_v8, %s74_s14 }
  0x16   :  { %51 = vrot.lane.b32.xlu0 %v50_v9, %s75_s15 }
  0x7c   :  { %v16_v10 = vpop.permute.xlu0 %15   ;;  %v28_v11 = vpop.permute.xlu1 %27  }
  0x7d   :  { %18 = vst.msk [vmem:[#allocation0] sm:$0x1] %vm17_vm1, %v16_v10  }
  0x80   :  { %v22_v12 = vpop.permute.xlu0 %21   ;;  %v34_v13 = vpop.permute.xlu1 %33  }
  0x81   :  { %24 = vst.msk [vmem:[#allocation0] sm:$0x1] %vm23_vm2, %v22_v12  }
  0x82   :  { %30 = vst.msk [vmem:[#allocation0] sm:$0x1] %vm29_vm3, %v28_v11  }
  0x83   :  { %36 = vst.msk [vmem:[#allocation0] sm:$0x1] %vm35_vm4, %v34_v13  }
  0x84   :  { %v40_v14 = vpop.permute.xlu0 %39   ;;  %v46_v15 = vpop.permute.xlu1 %45  }
  0x85   :  { %42 = vst.msk [vmem:[#allocation0] sm:$0x1] %vm41_vm5, %v40_v14  }
  0x86   :  { %48 = vst.msk [vmem:[#allocation0] sm:$0x1] %vm47_vm6, %v46_v15  }
  0x88   :  { %v52_v16 = vpop.permute.xlu0 %51  }
  0x89   :  { %54 = vst.msk [vmem:[#allocation0] sm:$0x1] %vm53_vm7, %v52_v16  }
  0x90   :  { %v58_v17 = vld [vmem:[#allocation0] sm:$0x1] }
  0x91   :  { %60 = vst [vmem:[%s96_s1] sm:$0x1] %v58_v17 }

// kernel: emotion_model_head_forward.1
= control target key start
LH: loop header
LB: loop body
LE: loop exit
PB: predicated region body
PF: predicated region fallthrough
CT: control target
= control target key end

     0   :  { %10 = vsyncpa [#allocation3], 0  ;;  %s1071_s0 = inlined_call_operand.vmem [shape: f32[8,128], index: 0, kind: input, shape index: {}]   ;;  %s1072_s1 = inlined_call_operand.hbm [shape: bf16[4,128,128], index: 1, kind: input, shape index: {}]   ;;  %s1073_s2 = inlined_call_operand.vmem [shape: f32[1,128], index: 2, kind: input, shape index: {}]   ;;  %s1074_s3 = inlined_call_operand.hbm [shape: f32[8,128], index: 3, kind: output, shape index: {0}]   ;;  %s1075_s4 = inlined_call_operand.vmem [shape: f32[8,128], index: 4, kind: output, shape index: {1}]  }
   0x1   :  { %11 = vsyncpa [#allocation4], 0  ;;  %s910_s15 = smov [#allocation2]   ;;  %s862_s19 = scalar_lea.hbm %s1072_s1, 4096 }
   0x2   :  { %s19_s16 = sshll.u32 %s910_s15, 4  ;;  %p863_p0 = scmp.ne.s32.totalorder %s1072_s1, %s862_s19  ;;  %s20_s16 = int_to_ptr.vmem [resolvable:$true] %s19_s16 }
   0x3   :  { %p866_p1 = scmp.lt.u32.totalorder %s862_s19, %s1072_s1 }
   0x5   :  { %p868_p2 = pnand %p866_p1, %p863_p0 }
   0x7   :  { %871 = shalt.err (!%p868_p2)
}
   0x8   :  { %s872_s24 = scalar_lea.vmem %s20_s16, 4096  ;;  %p877_p4 = scmp.lt.s32.totalorder %s20_s16, %s20_s16 }
   0x9   :  { %p873_p3 = scmp.ne.s32.totalorder %s20_s16, %s872_s24  ;;  %p878_p5 = scmp.lt.s32.totalorder %s872_s24, %s872_s24 }
   0xb   :  { %p879_p6 = por %p878_p5, %p877_p4 }
   0xd   :  { %p880_p7 = pnand %p879_p6, %p873_p3 }
   0xf   :  { %883 = shalt.err (!%p880_p7)
}
  0x10   :  { %s911_s25 = smov 64   ;;  %s912_s26 = smov 4  }
  0x11   :  { %25 = dma.hbm_to_vmem [thread:$0]  %s1072_s1, 4096, %s20_s16, [#allocation3], %s911_s25, %s911_s25, %s912_s26  }
  0x12   :  { %906 = dma.done.wait [#allocation3], 4096  }
  0x13   :  { %907 = vsyncadd [#allocation3], 4294963200  ;;  %v913_v0 = vmov 0.0   ;;  %vm914_vm0 = vmmov 0   ;;  %v822_v1 = vld [vmem:[#allocation2] sm:$0xff]   ;;  %v823_v2 = vld [vmem:[#allocation2 + $0x8] sm:$0xff]   ;;  %v467_v50 = vlaneseq }
  0x14   :  { %716 = vmatprep.subr.bf16.mxu0 %v913_v0  ;;  %732 = vmatprep.mubr.msk.bf16.mxu0 %vm914_vm0, %v913_v0  ;;  %v824_v3 = vld [vmem:[#allocation2 + $0x10] sm:$0xff]   ;;  %v830_v4 = vld [vmem:[#allocation2 + $0x40] sm:$0xff]   ;;  %v825_v5 = vld [vmem:[#allocation2 + $0x18] sm:$0xff]  }
  0x15   :  { %736 = vmatprep.subr.bf16.mxu1 %v913_v0  ;;  %752 = vmatprep.mubr.msk.bf16.mxu1 %vm914_vm0, %v913_v0  ;;  %v831_v6 = vld [vmem:[#allocation2 + $0x48] sm:$0xff]   ;;  %v826_v7 = vld [vmem:[#allocation2 + $0x20] sm:$0xff]   ;;  %v832_v8 = vld [vmem:[#allocation2 + $0x50] sm:$0xff]   ;;  %v1006_v52 = vshrl.u32 %v467_v50, 7 }
  0x16   :  { %717 = vmatpush3.bf16.msra.mxu0 %v822_v1  ;;  %737 = vmatpush3.bf16.msra.mxu1 %v830_v4  ;;  %v827_v9 = vld [vmem:[#allocation2 + $0x28] sm:$0xff]   ;;  %v833_v10 = vld [vmem:[#allocation2 + $0x58] sm:$0xff]   ;;  %v828_v11 = vld [vmem:[#allocation2 + $0x30] sm:$0xff]  }
  0x17   :  { %718 = vmatprep.subr.bf16.mxu0 %v913_v0  ;;  %738 = vmatprep.subr.bf16.mxu1 %v913_v0  ;;  %v829_v12 = vld [vmem:[#allocation2 + $0x38] sm:$0xff]   ;;  %v32_v13 = vld [vmem:[%s1071_s0] sm:$0xff]  ;;  %v835_v16 = vld [vmem:[#allocation2 + $0x68] sm:$0xff]   ;;  %v469_v53 = vadd.s32 8, %v1006_v52  ;;  %v484_v54 = vcvt.s32.f32 %v1006_v52  ;;  %v503_v55 = vsub.s32 0, %v1006_v52  ;;  %v470_v56 = vadd.s32 16, %v1006_v52 }
  0x18   :  { %v33_v14 = vpack.c.bf16 %v32_v13, %v32_v13  ;;  %v834_v15 = vld [vmem:[#allocation2 + $0x60] sm:$0xff]   ;;  %v836_v17 = vld [vmem:[#allocation2 + $0x70] sm:$0xff]   ;;  %v837_v18 = vld [vmem:[#allocation2 + $0x78] sm:$0xff]   ;;  %v471_v57 = vadd.s32 24, %v1006_v52  ;;  %v472_v58 = vadd.s32 32, %v1006_v52  ;;  %v473_v59 = vadd.s32 40, %v1006_v52 }
  0x19   :  { %v838_v19 = vld [vmem:[#allocation2 + $0x80] sm:$0xff]   ;;  %v839_v20 = vld [vmem:[#allocation2 + $0x88] sm:$0xff]   ;;  %v840_v21 = vld [vmem:[#allocation2 + $0x90] sm:$0xff]   ;;  %v474_v60 = vadd.s32 48, %v1006_v52  ;;  %v485_v61 = vcvt.s32.f32 %v469_v53  ;;  %v486_v63 = vcvt.s32.f32 %v470_v56  ;;  %v475_v1 = vadd.s32 56, %v1006_v52 }
  0x1a   :  { %719 = vmatpush3.bf16.msra.mxu0 %v823_v2  ;;  %739 = vmatpush3.bf16.msra.mxu1 %v831_v6  ;;  %v841_v22 = vld [vmem:[#allocation2 + $0x98] sm:$0xff]   ;;  %v842_v30 = vld [vmem:[#allocation2 + $0xa0] sm:$0xff]   ;;  %v843_v31 = vld [vmem:[#allocation2 + $0xa8] sm:$0xff]   ;;  %v487_v2 = vcvt.s32.f32 %v471_v57  ;;  %v489_v4 = vcvt.s32.f32 %v473_v59  ;;  %v477_v53 = vadd.s32 72, %v1006_v52  ;;  %v479_v59 = vadd.s32 88, %v1006_v52 }
  0x1b   :  { %720 = vmatprep.subr.bf16.mxu0 %v913_v0  ;;  %740 = vmatprep.subr.bf16.mxu1 %v913_v0  ;;  %v844_v32 = vld [vmem:[#allocation2 + $0xb0] sm:$0xff]   ;;  %v845_v33 = vld [vmem:[#allocation2 + $0xb8] sm:$0xff]   ;;  %v846_v34 = vld [vmem:[#allocation2 + $0xc0] sm:$0xff]  }
  0x1c   :  { %v847_v35 = vld [vmem:[#allocation2 + $0xc8] sm:$0xff]   ;;  %v848_v36 = vld [vmem:[#allocation2 + $0xd0] sm:$0xff]   ;;  %v849_v37 = vld [vmem:[#allocation2 + $0xd8] sm:$0xff]  }
  0x1d   :  { %v850_v45 = vld [vmem:[#allocation2 + $0xe0] sm:$0xff]   ;;  %v851_v46 = vld [vmem:[#allocation2 + $0xe8] sm:$0xff]   ;;  %v852_v47 = vld [vmem:[#allocation2 + $0xf0] sm:$0xff]  }
  0x1e   :  { %721 = vmatpush3.bf16.msra.mxu0 %v824_v3  ;;  %741 = vmatpush3.bf16.msra.mxu1 %v832_v8  ;;  %v853_v48 = vld [vmem:[#allocation2 + $0xf8] sm:$0xff]   ;;  %v465_v49 = vld [vmem:[%s1073_s2] sm:$0x1]  ;;  %v488_v3 = vcvt.s32.f32 %v472_v58  ;;  %v478_v58 = vadd.s32 80, %v1006_v52  ;;  %s915_s2 = smov [#allocation5]  }
  0x1f   :  { %722 = vmatprep.subr.bf16.mxu0 %v913_v0  ;;  %742 = vmatprep.subr.bf16.mxu1 %v913_v0  ;;  %v466_v51 = vmul.f32 127.0, %v465_v49  ;;  %s626_s5 = sshll.u32 %s915_s2, 4  ;;  %s627_s5 = int_to_ptr.vmem [resolvable:$true] %s626_s5 }
  0x20   :  { %s884_s6 = scalar_lea.vmem %s627_s5, 128  ;;  %p889_p9 = scmp.lt.s32.totalorder %s627_s5, %s627_s5 }
  0x21   :  { %v1016_v62 = vrot.slane %v466_v51, %v503_v55  ;;  %v476_v51 = vadd.s32 64, %v1006_v52  ;;  %v493_v55 = vcvt.s32.f32 %v477_v53  ;;  %p885_p8 = scmp.ne.s32.totalorder %s627_s5, %s884_s6  ;;  %p890_p10 = scmp.lt.s32.totalorder %s884_s6, %s884_s6 }
  0x22   :  { %723 = vmatpush3.bf16.msra.mxu0 %v825_v5  ;;  %743 = vmatpush3.bf16.msra.mxu1 %v833_v10  ;;  %v490_v5 = vcvt.s32.f32 %v474_v60 }
  0x23   :  { %724 = vmatprep.subr.bf16.mxu0 %v913_v0  ;;  %744 = vmatprep.subr.bf16.mxu1 %v913_v0  ;;  %v506_v6 = vsub.f32 %v1016_v62, %v484_v54  ;;  %v508_v8 = vsub.f32 %v1016_v62, %v486_v63  ;;  %v509_v10 = vsub.f32 %v1016_v62, %v487_v2  ;;  %v492_v54 = vcvt.s32.f32 %v476_v51  ;;  %p891_p11 = por %p890_p10, %p889_p9 }
  0x24   :  { %v515_v57 = vsub.f32 %v1016_v62, %v493_v55  ;;  %v495_v63 = vcvt.s32.f32 %v479_v59 }
  0x25   :  { %v514_v56 = vsub.f32 %v1016_v62, %v492_v54  ;;  %p892_p12 = pnand %p891_p11, %p885_p8 }
  0x26   :  { %725 = vmatpush3.bf16.msra.mxu0 %v826_v7  ;;  %745 = vmatpush3.bf16.msra.mxu1 %v834_v15  ;;  %v507_v7 = vsub.f32 %v1016_v62, %v485_v61  ;;  %v531_v60 = vand.u32 2147483647, %v515_v57  ;;  %v494_v61 = vcvt.s32.f32 %v478_v58 }
  0x27   :  { %726 = vmatprep.subr.bf16.mxu0 %v913_v0  ;;  %746 = vmatprep.subr.bf16.mxu1 %v913_v0 }
  0x28   :  { %v523_v15 = vand.u32 2147483647, %v507_v7  ;;  %v547_v2 = vsub.f32 1.0, %v531_v60 }
  0x2a   :  { %727 = vmatpush3.bf16.msra.mxu0 %v827_v9  ;;  %747 = vmatpush3.bf16.msra.mxu1 %v835_v16  ;;  %v491_v9 = vcvt.s32.f32 %v475_v1  ;;  %v524_v16 = vand.u32 2147483647, %v508_v8  ;;  %v563_v8 = vmax.f32 %v547_v2, 0.0 }
  0x2b   :  { %728 = vmatprep.subr.bf16.mxu0 %v913_v0  ;;  %748 = vmatprep.subr.bf16.mxu1 %v913_v0 }
  0x2e   :  { %729 = vmatpush3.bf16.msra.mxu0 %v828_v11  ;;  %749 = vmatpush3.bf16.msra.mxu1 %v836_v17  ;;  %v510_v11 = vsub.f32 %v1016_v62, %v488_v3  ;;  %v513_v17 = vsub.f32 %v1016_v62, %v491_v9  ;;  %v516_v3 = vsub.f32 %v1016_v62, %v494_v61 }
  0x2f   :  { %730 = vmatprep.subr.bf16.mxu0 %v913_v0  ;;  %750 = vmatprep.subr.bf16.mxu1 %v913_v0 }
  0x30   :  { %v532_v9 = vand.u32 2147483647, %v516_v3 }
  0x32   :  { %731 = vmatpush3.bf16.msra.mxu0 %v829_v12  ;;  %751 = vmatpush3.bf16.msra.mxu1 %v837_v18  ;;  %v511_v12 = vsub.f32 %v1016_v62, %v489_v4  ;;  %v525_v18 = vand.u32 2147483647, %v509_v10  ;;  %v517_v4 = vsub.f32 %v1016_v62, %v495_v63 }
  0x33   :  { %756 = vmatprep.subr.bf16.mxu0 %v913_v0  ;;  %776 = vmatprep.subr.bf16.mxu1 %v913_v0 }
  0x34   :  { %v533_v10 = vand.u32 2147483647, %v517_v4 }
  0x35   :  { %733 = vmatmul.mubr.bf16.vlgmr.msra.gmra.mrb[0].mxu0 %v33_v14  ;;  %v522_v14 = vand.u32 2147483647, %v506_v6  ;;  %v481_v6 = vadd.s32 104, %v1006_v52 }
  0x36   :  { %772 = vmatprep.mubr.msk.bf16.mxu0 %vm914_vm0, %v913_v0  ;;  %757 = vmatpush3.bf16.msra.mxu0 %v838_v19  ;;  %v526_v19 = vand.u32 2147483647, %v510_v11 }
  0x37   :  { %758 = vmatprep.subr.bf16.mxu0 %v913_v0 }
  0x3a   :  { %759 = vmatpush3.bf16.msra.mxu0 %v839_v20  ;;  %v527_v20 = vand.u32 2147483647, %v511_v12  ;;  %v497_v12 = vcvt.s32.f32 %v481_v6 }
  0x3b   :  { %760 = vmatprep.subr.bf16.mxu0 %v913_v0 }
  0x3e   :  { %761 = vmatpush3.bf16.msra.mxu0 %v840_v21  ;;  %v538_v21 = vsub.f32 1.0, %v522_v14  ;;  %v548_v14 = vsub.f32 1.0, %v532_v9 }
  0x3f   :  { %762 = vmatprep.subr.bf16.mxu0 %v913_v0 }
  0x42   :  { %763 = vmatpush3.bf16.msra.mxu0 %v841_v22  ;;  %v539_v22 = vsub.f32 1.0, %v523_v15  ;;  %v549_v15 = vsub.f32 1.0, %v533_v10 }
  0x43   :  { %764 = vmatprep.subr.bf16.mxu0 %v913_v0 }
  0x46   :  { %765 = vmatpush3.bf16.msra.mxu0 %v842_v30 }
  0x47   :  { %766 = vmatprep.subr.bf16.mxu0 %v913_v0 }
  0x4a   :  { %767 = vmatpush3.bf16.msra.mxu0 %v843_v31  ;;  %v529_v31 = vand.u32 2147483647, %v513_v17 }
  0x4b   :  { %768 = vmatprep.subr.bf16.mxu0 %v913_v0 }
  0x4e   :  { %769 = vmatpush3.bf16.msra.mxu0 %v844_v32 }
  0x4f   :  { %770 = vmatprep.subr.bf16.mxu0 %v913_v0 }
  0x52   :  { %771 = vmatpush3.bf16.msra.mxu0 %v845_v33 }
  0x53   :  { %796 = vmatprep.subr.bf16.mxu0 %v913_v0 }
 0x108   :  { %v132_v23 = vpop.f32.mrb[0].mxu0 }
 0x109   :  { %854 = vtanh.f32 %v132_v23  ;;  %v734_v24 = vpop.f32.mrb[1].mxu0  ;;  %v540_v23 = vsub.f32 1.0, %v524_v16  ;;  %v482_v16 = vadd.s32 112, %v1006_v52 }
 0x10a   :  { %v135_v25 = vpop.f32.mrb[2].mxu0  ;;  %v541_v24 = vsub.f32 1.0, %v525_v18  ;;  %v519_v18 = vsub.f32 %v1016_v62, %v497_v12 }
 0x10b   :  { %v735_v26 = vpop.f32.mrb[3].mxu0  ;;  %v542_v25 = vsub.f32 1.0, %v526_v19  ;;  %v556_v30 = vmax.f32 %v540_v23, 0.0  ;;  %v483_v19 = vadd.s32 120, %v1006_v52 }
 0x10c   :  { %v543_v26 = vsub.f32 1.0, %v527_v20  ;;  %v557_v32 = vmax.f32 %v541_v24, 0.0  ;;  %v564_v20 = vmax.f32 %v548_v14, 0.0  ;;  %v535_v24 = vand.u32 2147483647, %v519_v18 }
 0x113   :  { %v855_v27 = vpop.eup %854 }
 0x114   :  { %v139_v28 = vadd.f32 %v855_v27, %v32_v13  ;;  %v512_v13 = vsub.f32 %v1016_v62, %v490_v5  ;;  %v480_v5 = vadd.s32 96, %v1006_v52 }
 0x116   :  { %v140_v29 = vpack.c.bf16 %v139_v28, %v139_v28  ;;  %v528_v27 = vand.u32 2147483647, %v512_v13  ;;  %v496_v11 = vcvt.s32.f32 %v480_v5 }
 0x118   :  { %753 = vmatmul.mubr.bf16.vlgmr.msra.gmra.mrb[0].mxu1 %v140_v29  ;;  %v555_v29 = vmax.f32 %v539_v22, 0.0  ;;  %v518_v17 = vsub.f32 %v1016_v62, %v496_v11  ;;  %v498_v22 = vcvt.s32.f32 %v482_v16 }
 0x119   :  { %792 = vmatprep.mubr.msk.bf16.mxu1 %vm914_vm0, %v913_v0  ;;  %777 = vmatpush3.bf16.msra.mxu1 %v846_v34  ;;  %v544_v34 = vsub.f32 1.0, %v528_v27 }
 0x11a   :  { %778 = vmatprep.subr.bf16.mxu1 %v913_v0  ;;  %v534_v23 = vand.u32 2147483647, %v518_v17  ;;  %v520_v27 = vsub.f32 %v1016_v62, %v498_v22 }
 0x11d   :  { %779 = vmatpush3.bf16.msra.mxu1 %v847_v35  ;;  %v572_v35 = vpack.c.bf16 %v557_v32, %v556_v30 }
 0x11e   :  { %780 = vmatprep.subr.bf16.mxu1 %v913_v0 }
 0x121   :  { %781 = vmatpush3.bf16.msra.mxu1 %v848_v36  ;;  %v558_v36 = vmax.f32 %v542_v25, 0.0  ;;  %v499_v25 = vcvt.s32.f32 %v483_v19 }
 0x122   :  { %782 = vmatprep.subr.bf16.mxu1 %v913_v0 }
 0x123   :  { %v521_v30 = vsub.f32 %v1016_v62, %v499_v25 }
 0x125   :  { %783 = vmatpush3.bf16.msra.mxu1 %v849_v37  ;;  %v559_v37 = vmax.f32 %v543_v26, 0.0 }
 0x126   :  { %784 = vmatprep.subr.bf16.mxu1 %v913_v0 }
 0x129   :  { %785 = vmatpush3.bf16.msra.mxu1 %v850_v45 }
 0x12a   :  { %786 = vmatprep.subr.bf16.mxu1 %v913_v0 }
 0x12d   :  { %787 = vmatpush3.bf16.msra.mxu1 %v851_v46 }
 0x12e   :  { %788 = vmatprep.subr.bf16.mxu1 %v913_v0 }
 0x131   :  { %789 = vmatpush3.bf16.msra.mxu1 %v852_v47 }
 0x132   :  { %790 = vmatprep.subr.bf16.mxu1 %v913_v0 }
 0x135   :  { %791 = vmatpush3.bf16.msra.mxu1 %v853_v48 }
 0x1eb   :  { %v240_v38 = vpop.f32.mrb[0].mxu1 }
 0x1ec   :  { %856 = vtanh.f32 %v240_v38  ;;  %v754_v39 = vpop.f32.mrb[1].mxu1  ;;  %v545_v38 = vsub.f32 1.0, %v529_v31  ;;  %v536_v31 = vand.u32 2147483647, %v520_v27 }
 0x1ed   :  { %v243_v40 = vpop.f32.mrb[2].mxu1  ;;  %v573_v39 = vpack.c.bf16 %v559_v37, %v558_v36 }
 0x1ee   :  { %v755_v41 = vpop.f32.mrb[3].mxu1  ;;  %v560_v40 = vmax.f32 %v544_v34, 0.0  ;;  %v552_v34 = vsub.f32 1.0, %v536_v31 }
 0x1ef   :  { %v561_v41 = vmax.f32 %v545_v38, 0.0 }
 0x1f0   :  { %v568_v37 = vmax.f32 %v552_v34, 0.0 }
 0x1f6   :  { %v857_v42 = vpop.eup %856 }
 0x1f7   :  { %v994_v43 = vadd.f32 %v857_v42, %v139_v28  ;;  %v554_v28 = vmax.f32 %v538_v21, 0.0  ;;  %v574_v42 = vpack.c.bf16 %v561_v41, %v560_v40  ;;  %v565_v21 = vmax.f32 %v549_v15, 0.0 }
 0x1f9   :  { %v248_v44 = vpack.c.bf16 %v994_v43, %v994_v43  ;;  %v571_v33 = vpack.c.bf16 %v555_v29, %v554_v28  ;;  %v576_v26 = vpack.c.bf16 %v565_v21, %v564_v20  ;;  %v550_v28 = vsub.f32 1.0, %v534_v23 }
 0x1fa   :  { %v551_v29 = vsub.f32 1.0, %v535_v24 }
 0x1fb   :  { %773 = vmatmul.mubr.bf16.vlgmr.msra.gmra.mrb[4].mxu0 %v248_v44  ;;  %v566_v52 = vmax.f32 %v550_v28, 0.0 }
 0x1fc   :  { %812 = vmatprep.mubr.msk.bf16.mxu0 %vm914_vm0, %v913_v0  ;;  %797 = vmatpush3.bf16.msra.mxu0 %v571_v33  ;;  %v567_v32 = vmax.f32 %v551_v29, 0.0  ;;  %v537_v33 = vand.u32 2147483647, %v521_v30 }
 0x1fd   :  { %798 = vmatprep.subr.bf16.mxu0 %v913_v0 }
 0x1fe   :  { %v553_v36 = vsub.f32 1.0, %v537_v33 }
 0x200   :  { %799 = vmatpush3.bf16.msra.mxu0 %v572_v35  ;;  %v577_v35 = vpack.c.bf16 %v567_v32, %v566_v52  ;;  %v569_v38 = vmax.f32 %v553_v36, 0.0 }
 0x201   :  { %800 = vmatprep.subr.bf16.mxu0 %v913_v0 }
 0x204   :  { %801 = vmatpush3.bf16.msra.mxu0 %v573_v39  ;;  %v578_v39 = vpack.c.bf16 %v569_v38, %v568_v37 }
 0x205   :  { %802 = vmatprep.subr.bf16.mxu0 %v913_v0 }
 0x208   :  { %803 = vmatpush3.bf16.msra.mxu0 %v574_v42 }
 0x209   :  { %804 = vmatprep.subr.bf16.mxu0 %v913_v0 }
 0x2ce   :  { %v348_v44 = vpop.f32.mrb[4].mxu0 }
 0x2cf   :  { %858 = vtanh.f32 %v348_v44  ;;  %v774_v45 = vpop.f32.mrb[5].mxu0 }
 0x2d0   :  { %v351_v46 = vpop.f32.mrb[6].mxu0 }
 0x2d1   :  { %v775_v47 = vpop.f32.mrb[7].mxu0 }
 0x2d9   :  { %v859_v48 = vpop.eup %858 }
 0x2da   :  { %v1032_v49 = vadd.f32 %v859_v48, %v994_v43  ;;  %v530_v43 = vand.u32 2147483647, %v514_v56 }
 0x2dc   :  { %v356_v50 = vpack.c.bf16 %v1032_v49, %v1032_v49  ;;  %v546_v1 = vsub.f32 1.0, %v530_v43 }
 0x2de   :  { %793 = vmatmul.mubr.bf16.vlgmr.msra.gmra.mrb[4].mxu1 %v356_v50  ;;  %v562_v7 = vmax.f32 %v546_v1, 0.0 }
 0x2e0   :  { %v575_v13 = vpack.c.bf16 %v563_v8, %v562_v7 }
 0x2e2   :  { %805 = vmatpush3.bf16.msra.mxu0 %v575_v13 }
 0x2e3   :  { %806 = vmatprep.subr.bf16.mxu0 %v913_v0 }
 0x2e6   :  { %807 = vmatpush3.bf16.msra.mxu0 %v576_v26 }
 0x2e7   :  { %808 = vmatprep.subr.bf16.mxu0 %v913_v0 }
 0x2ea   :  { %809 = vmatpush3.bf16.msra.mxu0 %v577_v35 }
 0x2eb   :  { %810 = vmatprep.subr.bf16.mxu0 %v913_v0 }
 0x2ee   :  { %811 = vmatpush3.bf16.msra.mxu0 %v578_v39 }
 0x3b1   :  { %v456_v40 = vpop.f32.mrb[4].mxu1 }
 0x3b2   :  { %860 = vtanh.f32 %v456_v40  ;;  %v794_v62 = vpop.f32.mrb[5].mxu1 }
 0x3b3   :  { %v459_v41 = vpop.f32.mrb[6].mxu1 }
 0x3b4   :  { %v795_v42 = vpop.f32.mrb[7].mxu1 }
 0x3bc   :  { %v861_v44 = vpop.eup %860 }
 0x3bd   :  { %v463_v45 = vadd.f32 %v861_v44, %v1032_v49 }
 0x3bf   :  { %v570_v46 = vpack.c.bf16 %v463_v45, %v463_v45  ;;  %464 = vst [vmem:[#allocation5] sm:$0xff] %v463_v45 }
 0x3c1   :  { %813 = vmatmul.mubr.bf16.vlgmr.msra.gmra.mrb[8].mxu0 %v570_v46 }
 0x3c2   :  { %895 = shalt.err (!%p892_p12)
}
 0x3c3   :  { %s896_s9 = scalar_lea.hbm %s1074_s3, 128 }
 0x3c4   :  { %p897_p13 = scmp.ne.s32.totalorder %s1074_s3, %s896_s9  ;;  %p900_p0 = scmp.lt.u32.totalorder %s896_s9, %s1074_s3 }
 0x3c6   :  { %p902_p1 = pnand %p900_p0, %p897_p13 }
 0x3c8   :  { %905 = shalt.err (!%p902_p1)
}
 0x3c9   :  { %629 = dma.vmem_to_hbm [thread:$0]  %s627_s5, 128, %s1074_s3, [#allocation4]  }
 0x494   :  { %v613_v0 = vpop.f32.mrb[8].mxu0 }
 0x495   :  { %619 = vst [vmem:[%s1075_s4] sm:$0xff] %v613_v0  ;;  %v814_v47 = vpop.f32.mrb[9].mxu0 }
 0x496   :  { %v616_v48 = vpop.f32.mrb[10].mxu0 }
 0x497   :  { %v815_v49 = vpop.f32.mrb[11].mxu0 }
 0x498   :  { %908 = dma.done.wait [#allocation4], 128  }
 0x499   :  { %909 = vsyncadd [#allocation4], 4294967168 }
 0x49a   :  { %637 = vsyncpa [#allocation3], 1 }
 0x49b   :  { %638 = vsyncpa [#allocation4], 1 }

</bundles_post_ra>
